<compile_context>
chip_gen: v5e
topology: v5e:2x2
jax: 0.10.0
libtpu: 0.0.40
codegen_flags: <defaults>
</compile_context>

<pallas_src>
import functools

import numpy as np
import jax
import jax.numpy as jnp
from jax import lax
from jax.experimental import pallas as pl
from jax.experimental.pallas import tpu as pltpu

ALPHA = 4


def _torch_linspace_long(end: int, steps: int):
    """Emulate torch.linspace(0, end, steps) (float32 default dtype) + .long().

    Torch's CPU/GPU kernels compute step = end/(steps-1) in float32 and use
    value = step*i for i < steps//2, value = end - step*(steps-1-i) otherwise,
    then .long() truncates toward zero.
    """
    if steps <= 0:
        return ()
    if steps == 1:
        return (0,)
    end_f = np.float32(end)
    step = np.float32(end_f / np.float32(steps - 1))
    halfway = steps // 2
    out = []
    for i in range(steps):
        if i < halfway:
            v = np.float32(step * np.float32(i))
        else:
            v = np.float32(end_f - step * np.float32(steps - 1 - i))
        out.append(int(v))  # truncation toward zero, like .long()
    return tuple(out)


def _gather_frames_kernel(x_hbm, o_hbm, sem, *, idx):
    """Pure-DMA temporal gather (fallback for non-uniform index sets).

    x_hbm: (C, T, H*W) ref left in HBM (memory_space=pl.ANY)
    o_hbm: (C, n_slow, H*W) ref left in HBM
    sem:   (n_slow,) DMA semaphores, one per in-flight copy
    idx:   static tuple of source temporal indices (compile-time constants)
    """
    copies = []
    for i, t in enumerate(idx):
        cp = pltpu.make_async_copy(
            x_hbm.at[:, pl.ds(t, 1), :],
            o_hbm.at[:, pl.ds(i, 1), :],
            sem.at[i],
        )
        cp.start()
        copies.append(cp)
    # All n_slow copies are in flight concurrently; now drain them.
    for cp in copies:
        cp.wait()


def pack_pathway(frames: jax.Array, *, force_pallas: bool = False):
    """JAX/Pallas equivalent of PackPathway.forward.

    Args:
      frames: (C, T, H, W) array.
      force_pallas: run the Pallas DMA gather even when a fused strided
        slice would suffice (used for testing the kernel path).
    Returns:
      [slow_pathway (C, T//ALPHA, H, W), fast_pathway (C, T, H, W)]
    """
    C, T, H, W = frames.shape
    n_slow = T // ALPHA

    # Fast pathway is the identity — the original frames.
    fast_pathway = frames

    if n_slow == 0:
        # Degenerate case (T < ALPHA): empty slow pathway, skip the kernel.
        return [jnp.zeros((C, 0, H, W), dtype=frames.dtype), fast_pathway]

    idx = _torch_linspace_long(T - 1, n_slow)

    if n_slow > 1:
        diffs = np.diff(np.asarray(idx, dtype=np.int64))
        uniform = bool(np.all(diffs == diffs[0])) and int(diffs[0]) >= 1
        stride = int(diffs[0]) if uniform else 0
    else:
        uniform, stride = True, 1

    if uniform and not force_pallas:
        # Constant spacing: a strided slice is exactly the same gather and is
        # fusible into the consumer — no HBM materialization, no kernel launch.
        limit = idx[0] + (n_slow - 1) * stride + 1
        slow_pathway = lax.slice(
            frames,
            (0, idx[0], 0, 0),
            (C, limit, H, W),
            (1, stride, 1, 1),
        )
        return [slow_pathway, fast_pathway]

    # General (non-uniform) index set: zero-compute HBM->HBM DMA gather.
    # Free metadata reshape: each (C-row, frame) slab becomes one contiguous
    # H*W run in HBM -> long contiguous DMA bursts.
    x2d = frames.reshape(C, T, H * W)
    bytes_accessed = 2 * C * n_slow * H * W * frames.dtype.itemsize

    slow2d = pl.pallas_call(
        functools.partial(_gather_frames_kernel, idx=idx),
        out_shape=jax.ShapeDtypeStruct((C, n_slow, H * W), frames.dtype),
        in_specs=[pl.BlockSpec(memory_space=pl.ANY)],   # raw HBM ref, no auto-DMA
        out_specs=pl.BlockSpec(memory_space=pl.ANY),    # written only via DMA
        scratch_shapes=[pltpu.SemaphoreType.DMA((n_slow,))],
        compiler_params=pltpu.CompilerParams(has_side_effects=True),
        cost_estimate=pl.CostEstimate(
            flops=0, transcendentals=0, bytes_accessed=bytes_accessed),
    )(x2d)

    slow_pathway = slow2d.reshape(C, n_slow, H, W)
    return [slow_pathway, fast_pathway]


if __name__ == "__main__":
    key = jax.random.PRNGKey(0)

    def run_and_check(frames, *, force_pallas=False):
        C, T, H, W = frames.shape
        n_slow = T // ALPHA
        slow, fast = pack_pathway(frames, force_pallas=force_pallas)
        slow = jax.block_until_ready(slow)
        fast = jax.block_until_ready(fast)

        idx_ref = np.asarray(_torch_linspace_long(T - 1, n_slow), dtype=np.int64)
        slow_ref = np.asarray(frames)[:, idx_ref, :, :]

        assert slow.shape == (C, n_slow, H, W)
        assert fast.shape == (C, T, H, W)
        np.testing.assert_array_equal(np.asarray(slow), slow_ref)
        np.testing.assert_array_equal(np.asarray(fast), np.asarray(frames))

    k1, k2 = jax.random.split(key)

    # T=32 -> indices [0,4,8,13,17,22,26,31] (non-uniform): Pallas DMA gather.
    frames_nonuniform = jax.random.normal(k1, (3, 32, 16, 16), dtype=jnp.float32)
    run_and_check(frames_nonuniform)

    # T=16 -> indices [0,5,10,15] (uniform stride 5): fused strided-slice path.
    frames_uniform = jax.random.normal(k2, (3, 16, 16, 16), dtype=jnp.float32)
    run_and_check(frames_uniform)
    # ...and the same input forced through the Pallas gather kernel.
    run_and_check(frames_uniform, force_pallas=True)

    print("KERNEL_OK")
</pallas_src>

<mosaic_0001>
module attributes {stable_mosaic.version = 11 : i64} {
  func.func @_gather_frames_kernel(%arg0: memref<3x32x256xf32, #tpu.memory_space<any>>, %arg1: memref<3x8x256xf32, #tpu.memory_space<any>>, %arg2: memref<8x!tpu.dma_semaphore, #tpu.memory_space<semaphore_mem>>) attributes {dimension_semantics = [], scalar_prefetch = 0 : i64, scratch_operands = 1 : i64, tpu.core_type = #tpu.core_type<tc>} {
    %c0_i32 = arith.constant 0 : i32
    %c0_i32_0 = arith.constant 0 : i32
    %c0_i32_1 = arith.constant 0 : i32
    %c0_i32_2 = arith.constant 0 : i32
    %0 = tpu.memref_slice %arg0[%c0_i32_0, %c0_i32_1, %c0_i32_2] : memref<3x32x256xf32, #tpu.memory_space<any>> -> memref<3x1x256xf32, #tpu.memory_space<any>>
    %c0_i32_3 = arith.constant 0 : i32
    %c0_i32_4 = arith.constant 0 : i32
    %c0_i32_5 = arith.constant 0 : i32
    %1 = tpu.memref_slice %arg1[%c0_i32_3, %c0_i32_4, %c0_i32_5] : memref<3x8x256xf32, #tpu.memory_space<any>> -> memref<3x1x256xf32, #tpu.memory_space<any>>
    %2 = tpu.memref_slice %arg2[%c0_i32] : memref<8x!tpu.dma_semaphore, #tpu.memory_space<semaphore_mem>> -> memref<1x!tpu.dma_semaphore, #tpu.memory_space<semaphore_mem>>
    %3 = tpu.memref_squeeze %2 : memref<1x!tpu.dma_semaphore, #tpu.memory_space<semaphore_mem>> -> memref<!tpu.dma_semaphore, #tpu.memory_space<semaphore_mem>>
    tpu.enqueue_dma source(%0 : memref<3x1x256xf32, #tpu.memory_space<any>>) target(%1 : memref<3x1x256xf32, #tpu.memory_space<any>>) target_semaphore(%3 : memref<!tpu.dma_semaphore, #tpu.memory_space<semaphore_mem>>)
    %c1_i32 = arith.constant 1 : i32
    %c0_i32_6 = arith.constant 0 : i32
    %c4_i32 = arith.constant 4 : i32
    %c0_i32_7 = arith.constant 0 : i32
    %4 = tpu.memref_slice %arg0[%c0_i32_6, %c4_i32, %c0_i32_7] : memref<3x32x256xf32, #tpu.memory_space<any>> -> memref<3x1x256xf32, #tpu.memory_space<any>>
    %c0_i32_8 = arith.constant 0 : i32
    %c1_i32_9 = arith.constant 1 : i32
    %c0_i32_10 = arith.constant 0 : i32
    %5 = tpu.memref_slice %arg1[%c0_i32_8, %c1_i32_9, %c0_i32_10] : memref<3x8x256xf32, #tpu.memory_space<any>> -> memref<3x1x256xf32, #tpu.memory_space<any>>
    %6 = tpu.memref_slice %arg2[%c1_i32] : memref<8x!tpu.dma_semaphore, #tpu.memory_space<semaphore_mem>> -> memref<1x!tpu.dma_semaphore, #tpu.memory_space<semaphore_mem>>
    %7 = tpu.memref_squeeze %6 : memref<1x!tpu.dma_semaphore, #tpu.memory_space<semaphore_mem>> -> memref<!tpu.dma_semaphore, #tpu.memory_space<semaphore_mem>>
    tpu.enqueue_dma source(%4 : memref<3x1x256xf32, #tpu.memory_space<any>>) target(%5 : memref<3x1x256xf32, #tpu.memory_space<any>>) target_semaphore(%7 : memref<!tpu.dma_semaphore, #tpu.memory_space<semaphore_mem>>)
    %c2_i32 = arith.constant 2 : i32
    %c0_i32_11 = arith.constant 0 : i32
    %c8_i32 = arith.constant 8 : i32
    %c0_i32_12 = arith.constant 0 : i32
    %8 = tpu.memref_slice %arg0[%c0_i32_11, %c8_i32, %c0_i32_12] : memref<3x32x256xf32, #tpu.memory_space<any>> -> memref<3x1x256xf32, #tpu.memory_space<any>>
    %c0_i32_13 = arith.constant 0 : i32
    %c2_i32_14 = arith.constant 2 : i32
    %c0_i32_15 = arith.constant 0 : i32
    %9 = tpu.memref_slice %arg1[%c0_i32_13, %c2_i32_14, %c0_i32_15] : memref<3x8x256xf32, #tpu.memory_space<any>> -> memref<3x1x256xf32, #tpu.memory_space<any>>
    %10 = tpu.memref_slice %arg2[%c2_i32] : memref<8x!tpu.dma_semaphore, #tpu.memory_space<semaphore_mem>> -> memref<1x!tpu.dma_semaphore, #tpu.memory_space<semaphore_mem>>
    %11 = tpu.memref_squeeze %10 : memref<1x!tpu.dma_semaphore, #tpu.memory_space<semaphore_mem>> -> memref<!tpu.dma_semaphore, #tpu.memory_space<semaphore_mem>>
    tpu.enqueue_dma source(%8 : memref<3x1x256xf32, #tpu.memory_space<any>>) target(%9 : memref<3x1x256xf32, #tpu.memory_space<any>>) target_semaphore(%11 : memref<!tpu.dma_semaphore, #tpu.memory_space<semaphore_mem>>)
    %c3_i32 = arith.constant 3 : i32
    %c0_i32_16 = arith.constant 0 : i32
    %c13_i32 = arith.constant 13 : i32
    %c0_i32_17 = arith.constant 0 : i32
    %12 = tpu.memref_slice %arg0[%c0_i32_16, %c13_i32, %c0_i32_17] : memref<3x32x256xf32, #tpu.memory_space<any>> -> memref<3x1x256xf32, #tpu.memory_space<any>>
    %c0_i32_18 = arith.constant 0 : i32
    %c3_i32_19 = arith.constant 3 : i32
    %c0_i32_20 = arith.constant 0 : i32
    %13 = tpu.memref_slice %arg1[%c0_i32_18, %c3_i32_19, %c0_i32_20] : memref<3x8x256xf32, #tpu.memory_space<any>> -> memref<3x1x256xf32, #tpu.memory_space<any>>
    %14 = tpu.memref_slice %arg2[%c3_i32] : memref<8x!tpu.dma_semaphore, #tpu.memory_space<semaphore_mem>> -> memref<1x!tpu.dma_semaphore, #tpu.memory_space<semaphore_mem>>
    %15 = tpu.memref_squeeze %14 : memref<1x!tpu.dma_semaphore, #tpu.memory_space<semaphore_mem>> -> memref<!tpu.dma_semaphore, #tpu.memory_space<semaphore_mem>>
    tpu.enqueue_dma source(%12 : memref<3x1x256xf32, #tpu.memory_space<any>>) target(%13 : memref<3x1x256xf32, #tpu.memory_space<any>>) target_semaphore(%15 : memref<!tpu.dma_semaphore, #tpu.memory_space<semaphore_mem>>)
    %c4_i32_21 = arith.constant 4 : i32
    %c0_i32_22 = arith.constant 0 : i32
    %c17_i32 = arith.constant 17 : i32
    %c0_i32_23 = arith.constant 0 : i32
    %16 = tpu.memref_slice %arg0[%c0_i32_22, %c17_i32, %c0_i32_23] : memref<3x32x256xf32, #tpu.memory_space<any>> -> memref<3x1x256xf32, #tpu.memory_space<any>>
    %c0_i32_24 = arith.constant 0 : i32
    %c4_i32_25 = arith.constant 4 : i32
    %c0_i32_26 = arith.constant 0 : i32
    %17 = tpu.memref_slice %arg1[%c0_i32_24, %c4_i32_25, %c0_i32_26] : memref<3x8x256xf32, #tpu.memory_space<any>> -> memref<3x1x256xf32, #tpu.memory_space<any>>
    %18 = tpu.memref_slice %arg2[%c4_i32_21] : memref<8x!tpu.dma_semaphore, #tpu.memory_space<semaphore_mem>> -> memref<1x!tpu.dma_semaphore, #tpu.memory_space<semaphore_mem>>
    %19 = tpu.memref_squeeze %18 : memref<1x!tpu.dma_semaphore, #tpu.memory_space<semaphore_mem>> -> memref<!tpu.dma_semaphore, #tpu.memory_space<semaphore_mem>>
    tpu.enqueue_dma source(%16 : memref<3x1x256xf32, #tpu.memory_space<any>>) target(%17 : memref<3x1x256xf32, #tpu.memory_space<any>>) target_semaphore(%19 : memref<!tpu.dma_semaphore, #tpu.memory_space<semaphore_mem>>)
    %c5_i32 = arith.constant 5 : i32
    %c0_i32_27 = arith.constant 0 : i32
    %c22_i32 = arith.constant 22 : i32
    %c0_i32_28 = arith.constant 0 : i32
    %20 = tpu.memref_slice %arg0[%c0_i32_27, %c22_i32, %c0_i32_28] : memref<3x32x256xf32, #tpu.memory_space<any>> -> memref<3x1x256xf32, #tpu.memory_space<any>>
    %c0_i32_29 = arith.constant 0 : i32
    %c5_i32_30 = arith.constant 5 : i32
    %c0_i32_31 = arith.constant 0 : i32
    %21 = tpu.memref_slice %arg1[%c0_i32_29, %c5_i32_30, %c0_i32_31] : memref<3x8x256xf32, #tpu.memory_space<any>> -> memref<3x1x256xf32, #tpu.memory_space<any>>
    %22 = tpu.memref_slice %arg2[%c5_i32] : memref<8x!tpu.dma_semaphore, #tpu.memory_space<semaphore_mem>> -> memref<1x!tpu.dma_semaphore, #tpu.memory_space<semaphore_mem>>
    %23 = tpu.memref_squeeze %22 : memref<1x!tpu.dma_semaphore, #tpu.memory_space<semaphore_mem>> -> memref<!tpu.dma_semaphore, #tpu.memory_space<semaphore_mem>>
    tpu.enqueue_dma source(%20 : memref<3x1x256xf32, #tpu.memory_space<any>>) target(%21 : memref<3x1x256xf32, #tpu.memory_space<any>>) target_semaphore(%23 : memref<!tpu.dma_semaphore, #tpu.memory_space<semaphore_mem>>)
    %c6_i32 = arith.constant 6 : i32
    %c0_i32_32 = arith.constant 0 : i32
    %c26_i32 = arith.constant 26 : i32
    %c0_i32_33 = arith.constant 0 : i32
    %24 = tpu.memref_slice %arg0[%c0_i32_32, %c26_i32, %c0_i32_33] : memref<3x32x256xf32, #tpu.memory_space<any>> -> memref<3x1x256xf32, #tpu.memory_space<any>>
    %c0_i32_34 = arith.constant 0 : i32
    %c6_i32_35 = arith.constant 6 : i32
    %c0_i32_36 = arith.constant 0 : i32
    %25 = tpu.memref_slice %arg1[%c0_i32_34, %c6_i32_35, %c0_i32_36] : memref<3x8x256xf32, #tpu.memory_space<any>> -> memref<3x1x256xf32, #tpu.memory_space<any>>
    %26 = tpu.memref_slice %arg2[%c6_i32] : memref<8x!tpu.dma_semaphore, #tpu.memory_space<semaphore_mem>> -> memref<1x!tpu.dma_semaphore, #tpu.memory_space<semaphore_mem>>
    %27 = tpu.memref_squeeze %26 : memref<1x!tpu.dma_semaphore, #tpu.memory_space<semaphore_mem>> -> memref<!tpu.dma_semaphore, #tpu.memory_space<semaphore_mem>>
    tpu.enqueue_dma source(%24 : memref<3x1x256xf32, #tpu.memory_space<any>>) target(%25 : memref<3x1x256xf32, #tpu.memory_space<any>>) target_semaphore(%27 : memref<!tpu.dma_semaphore, #tpu.memory_space<semaphore_mem>>)
    %c7_i32 = arith.constant 7 : i32
    %c0_i32_37 = arith.constant 0 : i32
    %c31_i32 = arith.constant 31 : i32
    %c0_i32_38 = arith.constant 0 : i32
    %28 = tpu.memref_slice %arg0[%c0_i32_37, %c31_i32, %c0_i32_38] : memref<3x32x256xf32, #tpu.memory_space<any>> -> memref<3x1x256xf32, #tpu.memory_space<any>>
    %c0_i32_39 = arith.constant 0 : i32
    %c7_i32_40 = arith.constant 7 : i32
    %c0_i32_41 = arith.constant 0 : i32
    %29 = tpu.memref_slice %arg1[%c0_i32_39, %c7_i32_40, %c0_i32_41] : memref<3x8x256xf32, #tpu.memory_space<any>> -> memref<3x1x256xf32, #tpu.memory_space<any>>
    %30 = tpu.memref_slice %arg2[%c7_i32] : memref<8x!tpu.dma_semaphore, #tpu.memory_space<semaphore_mem>> -> memref<1x!tpu.dma_semaphore, #tpu.memory_space<semaphore_mem>>
    %31 = tpu.memref_squeeze %30 : memref<1x!tpu.dma_semaphore, #tpu.memory_space<semaphore_mem>> -> memref<!tpu.dma_semaphore, #tpu.memory_space<semaphore_mem>>
    tpu.enqueue_dma source(%28 : memref<3x1x256xf32, #tpu.memory_space<any>>) target(%29 : memref<3x1x256xf32, #tpu.memory_space<any>>) target_semaphore(%31 : memref<!tpu.dma_semaphore, #tpu.memory_space<semaphore_mem>>)
    %c0_i32_42 = arith.constant 0 : i32
    %c0_i32_43 = arith.constant 0 : i32
    %c0_i32_44 = arith.constant 0 : i32
    %c0_i32_45 = arith.constant 0 : i32
    %32 = tpu.memref_slice %arg0[%c0_i32_43, %c0_i32_44, %c0_i32_45] : memref<3x32x256xf32, #tpu.memory_space<any>> -> memref<3x1x256xf32, #tpu.memory_space<any>>
    %c0_i32_46 = arith.constant 0 : i32
    %c0_i32_47 = arith.constant 0 : i32
    %c0_i32_48 = arith.constant 0 : i32
    %33 = tpu.memref_slice %arg1[%c0_i32_46, %c0_i32_47, %c0_i32_48] : memref<3x8x256xf32, #tpu.memory_space<any>> -> memref<3x1x256xf32, #tpu.memory_space<any>>
    %34 = tpu.memref_slice %arg2[%c0_i32_42] : memref<8x!tpu.dma_semaphore, #tpu.memory_space<semaphore_mem>> -> memref<1x!tpu.dma_semaphore, #tpu.memory_space<semaphore_mem>>
    %35 = tpu.memref_squeeze %34 : memref<1x!tpu.dma_semaphore, #tpu.memory_space<semaphore_mem>> -> memref<!tpu.dma_semaphore, #tpu.memory_space<semaphore_mem>>
    tpu.wait_dma2 semaphore(%35 : memref<!tpu.dma_semaphore, #tpu.memory_space<semaphore_mem>>) src(%32 : memref<3x1x256xf32, #tpu.memory_space<any>>) dst(%33 : memref<3x1x256xf32, #tpu.memory_space<any>>)
    %c1_i32_49 = arith.constant 1 : i32
    %c0_i32_50 = arith.constant 0 : i32
    %c4_i32_51 = arith.constant 4 : i32
    %c0_i32_52 = arith.constant 0 : i32
    %36 = tpu.memref_slice %arg0[%c0_i32_50, %c4_i32_51, %c0_i32_52] : memref<3x32x256xf32, #tpu.memory_space<any>> -> memref<3x1x256xf32, #tpu.memory_space<any>>
    %c0_i32_53 = arith.constant 0 : i32
    %c1_i32_54 = arith.constant 1 : i32
    %c0_i32_55 = arith.constant 0 : i32
    %37 = tpu.memref_slice %arg1[%c0_i32_53, %c1_i32_54, %c0_i32_55] : memref<3x8x256xf32, #tpu.memory_space<any>> -> memref<3x1x256xf32, #tpu.memory_space<any>>
    %38 = tpu.memref_slice %arg2[%c1_i32_49] : memref<8x!tpu.dma_semaphore, #tpu.memory_space<semaphore_mem>> -> memref<1x!tpu.dma_semaphore, #tpu.memory_space<semaphore_mem>>
    %39 = tpu.memref_squeeze %38 : memref<1x!tpu.dma_semaphore, #tpu.memory_space<semaphore_mem>> -> memref<!tpu.dma_semaphore, #tpu.memory_space<semaphore_mem>>
    tpu.wait_dma2 semaphore(%39 : memref<!tpu.dma_semaphore, #tpu.memory_space<semaphore_mem>>) src(%36 : memref<3x1x256xf32, #tpu.memory_space<any>>) dst(%37 : memref<3x1x256xf32, #tpu.memory_space<any>>)
    %c2_i32_56 = arith.constant 2 : i32
    %c0_i32_57 = arith.constant 0 : i32
    %c8_i32_58 = arith.constant 8 : i32
    %c0_i32_59 = arith.constant 0 : i32
    %40 = tpu.memref_slice %arg0[%c0_i32_57, %c8_i32_58, %c0_i32_59] : memref<3x32x256xf32, #tpu.memory_space<any>> -> memref<3x1x256xf32, #tpu.memory_space<any>>
    %c0_i32_60 = arith.constant 0 : i32
    %c2_i32_61 = arith.constant 2 : i32
    %c0_i32_62 = arith.constant 0 : i32
    %41 = tpu.memref_slice %arg1[%c0_i32_60, %c2_i32_61, %c0_i32_62] : memref<3x8x256xf32, #tpu.memory_space<any>> -> memref<3x1x256xf32, #tpu.memory_space<any>>
    %42 = tpu.memref_slice %arg2[%c2_i32_56] : memref<8x!tpu.dma_semaphore, #tpu.memory_space<semaphore_mem>> -> memref<1x!tpu.dma_semaphore, #tpu.memory_space<semaphore_mem>>
    %43 = tpu.memref_squeeze %42 : memref<1x!tpu.dma_semaphore, #tpu.memory_space<semaphore_mem>> -> memref<!tpu.dma_semaphore, #tpu.memory_space<semaphore_mem>>
    tpu.wait_dma2 semaphore(%43 : memref<!tpu.dma_semaphore, #tpu.memory_space<semaphore_mem>>) src(%40 : memref<3x1x256xf32, #tpu.memory_space<any>>) dst(%41 : memref<3x1x256xf32, #tpu.memory_space<any>>)
    %c3_i32_63 = arith.constant 3 : i32
    %c0_i32_64 = arith.constant 0 : i32
    %c13_i32_65 = arith.constant 13 : i32
    %c0_i32_66 = arith.constant 0 : i32
    %44 = tpu.memref_slice %arg0[%c0_i32_64, %c13_i32_65, %c0_i32_66] : memref<3x32x256xf32, #tpu.memory_space<any>> -> memref<3x1x256xf32, #tpu.memory_space<any>>
    %c0_i32_67 = arith.constant 0 : i32
    %c3_i32_68 = arith.constant 3 : i32
    %c0_i32_69 = arith.constant 0 : i32
    %45 = tpu.memref_slice %arg1[%c0_i32_67, %c3_i32_68, %c0_i32_69] : memref<3x8x256xf32, #tpu.memory_space<any>> -> memref<3x1x256xf32, #tpu.memory_space<any>>
    %46 = tpu.memref_slice %arg2[%c3_i32_63] : memref<8x!tpu.dma_semaphore, #tpu.memory_space<semaphore_mem>> -> memref<1x!tpu.dma_semaphore, #tpu.memory_space<semaphore_mem>>
    %47 = tpu.memref_squeeze %46 : memref<1x!tpu.dma_semaphore, #tpu.memory_space<semaphore_mem>> -> memref<!tpu.dma_semaphore, #tpu.memory_space<semaphore_mem>>
    tpu.wait_dma2 semaphore(%47 : memref<!tpu.dma_semaphore, #tpu.memory_space<semaphore_mem>>) src(%44 : memref<3x1x256xf32, #tpu.memory_space<any>>) dst(%45 : memref<3x1x256xf32, #tpu.memory_space<any>>)
    %c4_i32_70 = arith.constant 4 : i32
    %c0_i32_71 = arith.constant 0 : i32
    %c17_i32_72 = arith.constant 17 : i32
    %c0_i32_73 = arith.constant 0 : i32
    %48 = tpu.memref_slice %arg0[%c0_i32_71, %c17_i32_72, %c0_i32_73] : memref<3x32x256xf32, #tpu.memory_space<any>> -> memref<3x1x256xf32, #tpu.memory_space<any>>
    %c0_i32_74 = arith.constant 0 : i32
    %c4_i32_75 = arith.constant 4 : i32
    %c0_i32_76 = arith.constant 0 : i32
    %49 = tpu.memref_slice %arg1[%c0_i32_74, %c4_i32_75, %c0_i32_76] : memref<3x8x256xf32, #tpu.memory_space<any>> -> memref<3x1x256xf32, #tpu.memory_space<any>>
    %50 = tpu.memref_slice %arg2[%c4_i32_70] : memref<8x!tpu.dma_semaphore, #tpu.memory_space<semaphore_mem>> -> memref<1x!tpu.dma_semaphore, #tpu.memory_space<semaphore_mem>>
    %51 = tpu.memref_squeeze %50 : memref<1x!tpu.dma_semaphore, #tpu.memory_space<semaphore_mem>> -> memref<!tpu.dma_semaphore, #tpu.memory_space<semaphore_mem>>
    tpu.wait_dma2 semaphore(%51 : memref<!tpu.dma_semaphore, #tpu.memory_space<semaphore_mem>>) src(%48 : memref<3x1x256xf32, #tpu.memory_space<any>>) dst(%49 : memref<3x1x256xf32, #tpu.memory_space<any>>)
    %c5_i32_77 = arith.constant 5 : i32
    %c0_i32_78 = arith.constant 0 : i32
    %c22_i32_79 = arith.constant 22 : i32
    %c0_i32_80 = arith.constant 0 : i32
    %52 = tpu.memref_slice %arg0[%c0_i32_78, %c22_i32_79, %c0_i32_80] : memref<3x32x256xf32, #tpu.memory_space<any>> -> memref<3x1x256xf32, #tpu.memory_space<any>>
    %c0_i32_81 = arith.constant 0 : i32
    %c5_i32_82 = arith.constant 5 : i32
    %c0_i32_83 = arith.constant 0 : i32
    %53 = tpu.memref_slice %arg1[%c0_i32_81, %c5_i32_82, %c0_i32_83] : memref<3x8x256xf32, #tpu.memory_space<any>> -> memref<3x1x256xf32, #tpu.memory_space<any>>
    %54 = tpu.memref_slice %arg2[%c5_i32_77] : memref<8x!tpu.dma_semaphore, #tpu.memory_space<semaphore_mem>> -> memref<1x!tpu.dma_semaphore, #tpu.memory_space<semaphore_mem>>
    %55 = tpu.memref_squeeze %54 : memref<1x!tpu.dma_semaphore, #tpu.memory_space<semaphore_mem>> -> memref<!tpu.dma_semaphore, #tpu.memory_space<semaphore_mem>>
    tpu.wait_dma2 semaphore(%55 : memref<!tpu.dma_semaphore, #tpu.memory_space<semaphore_mem>>) src(%52 : memref<3x1x256xf32, #tpu.memory_space<any>>) dst(%53 : memref<3x1x256xf32, #tpu.memory_space<any>>)
    %c6_i32_84 = arith.constant 6 : i32
    %c0_i32_85 = arith.constant 0 : i32
    %c26_i32_86 = arith.constant 26 : i32
    %c0_i32_87 = arith.constant 0 : i32
    %56 = tpu.memref_slice %arg0[%c0_i32_85, %c26_i32_86, %c0_i32_87] : memref<3x32x256xf32, #tpu.memory_space<any>> -> memref<3x1x256xf32, #tpu.memory_space<any>>
    %c0_i32_88 = arith.constant 0 : i32
    %c6_i32_89 = arith.constant 6 : i32
    %c0_i32_90 = arith.constant 0 : i32
    %57 = tpu.memref_slice %arg1[%c0_i32_88, %c6_i32_89, %c0_i32_90] : memref<3x8x256xf32, #tpu.memory_space<any>> -> memref<3x1x256xf32, #tpu.memory_space<any>>
    %58 = tpu.memref_slice %arg2[%c6_i32_84] : memref<8x!tpu.dma_semaphore, #tpu.memory_space<semaphore_mem>> -> memref<1x!tpu.dma_semaphore, #tpu.memory_space<semaphore_mem>>
    %59 = tpu.memref_squeeze %58 : memref<1x!tpu.dma_semaphore, #tpu.memory_space<semaphore_mem>> -> memref<!tpu.dma_semaphore, #tpu.memory_space<semaphore_mem>>
    tpu.wait_dma2 semaphore(%59 : memref<!tpu.dma_semaphore, #tpu.memory_space<semaphore_mem>>) src(%56 : memref<3x1x256xf32, #tpu.memory_space<any>>) dst(%57 : memref<3x1x256xf32, #tpu.memory_space<any>>)
    %c7_i32_91 = arith.constant 7 : i32
    %c0_i32_92 = arith.constant 0 : i32
    %c31_i32_93 = arith.constant 31 : i32
    %c0_i32_94 = arith.constant 0 : i32
    %60 = tpu.memref_slice %arg0[%c0_i32_92, %c31_i32_93, %c0_i32_94] : memref<3x32x256xf32, #tpu.memory_space<any>> -> memref<3x1x256xf32, #tpu.memory_space<any>>
    %c0_i32_95 = arith.constant 0 : i32
    %c7_i32_96 = arith.constant 7 : i32
    %c0_i32_97 = arith.constant 0 : i32
    %61 = tpu.memref_slice %arg1[%c0_i32_95, %c7_i32_96, %c0_i32_97] : memref<3x8x256xf32, #tpu.memory_space<any>> -> memref<3x1x256xf32, #tpu.memory_space<any>>
    %62 = tpu.memref_slice %arg2[%c7_i32_91] : memref<8x!tpu.dma_semaphore, #tpu.memory_space<semaphore_mem>> -> memref<1x!tpu.dma_semaphore, #tpu.memory_space<semaphore_mem>>
    %63 = tpu.memref_squeeze %62 : memref<1x!tpu.dma_semaphore, #tpu.memory_space<semaphore_mem>> -> memref<!tpu.dma_semaphore, #tpu.memory_space<semaphore_mem>>
    tpu.wait_dma2 semaphore(%63 : memref<!tpu.dma_semaphore, #tpu.memory_space<semaphore_mem>>) src(%60 : memref<3x1x256xf32, #tpu.memory_space<any>>) dst(%61 : memref<3x1x256xf32, #tpu.memory_space<any>>)
    return
  }
}

</mosaic_0001>

<bundles_post_ra>
// kernel: tpu_custom_call.1
= control target key start
LH: loop header
LB: loop body
LE: loop exit
PB: predicated region body
PF: predicated region fallthrough
CT: control target
= control target key end

     0   :  { %s354_s12 = smov 1024   ;;  %s355_s13 = smov 256   ;;  %s490_s0 = inlined_call_operand.hbm [shape: f32[3,32,256], index: 0, kind: input, shape index: {}]   ;;  %s491_s1 = inlined_call_operand.hbm [shape: f32[3,8,256], index: 1, kind: output, shape index: {}]  }
   0x1   :  { %s10_s8 = sshll.u32 %s490_s0, 4  ;;  %s12_s11 = sshll.u32 %s491_s1, 4  ;;  %s11_s8 = int_to_ptr.hbm [resolvable:$true] %s10_s8  ;;  %s13_s11 = int_to_ptr.hbm [resolvable:$true] %s12_s11 }
   0x2   :  { %19 = sst [smem:[#allocation4]] %s354_s12  ;;  %s356_s14 = smov 2  }
   0x3   :  { %21 = sst [smem:[#allocation4 + $0x1]] %s355_s13  ;;  %s357_s15 = smov 128  }
   0x4   :  { %23 = sst [smem:[#allocation4 + $0x2]] %s356_s14  ;;  %s358_s16 = smov 1  }
   0x5   :  { %25 = sst [smem:[#allocation4 + $0x3]] %s357_s15  ;;  %s359_s17 = smov [#allocation2]  }
   0x6   :  { %27 = sst [smem:[#allocation4 + $0x4]] %s357_s15  ;;  %s360_s18 = smov [#allocation3]  }
   0x7   :  { %29 = sst [smem:[#allocation4 + $0x5]] %s358_s16  ;;  %s361_s19 = smov 0  }
   0x8   :  { %31 = dma.general %s11_s8, 96, %s13_s11, %s359_s17, %s360_s18, [#allocation4], %s361_s19, 0  }
   0x9   :  { %48 = sst [smem:[#allocation6]] %s354_s12  ;;  %s32_s22 = scalar_lea.hbm %s490_s0, 4 }
   0xa   :  { %50 = sst [smem:[#allocation6 + $0x1]] %s355_s13  ;;  %s33_s25 = scalar_lea.hbm %s491_s1, 1 }
   0xb   :  { %52 = sst [smem:[#allocation6 + $0x2]] %s356_s14  ;;  %s39_s26 = sshll.u32 %s32_s22, 4  ;;  %s40_s26 = int_to_ptr.hbm [resolvable:$true] %s39_s26 }
   0xc   :  { %54 = sst [smem:[#allocation6 + $0x3]] %s357_s15  ;;  %s41_s27 = sshll.u32 %s33_s25, 4  ;;  %s42_s27 = int_to_ptr.hbm [resolvable:$true] %s41_s27 }
   0xd   :  { %56 = sst [smem:[#allocation6 + $0x4]] %s357_s15  ;;  %s362_s28 = smov [#allocation2 + $0x1]  }
   0xe   :  { %58 = sst [smem:[#allocation6 + $0x5]] %s358_s16  ;;  %s363_s29 = smov [#allocation5]  }
   0xf   :  { %60 = dma.general %s40_s26, 96, %s42_s27, %s362_s28, %s363_s29, [#allocation6], %s361_s19, 0  }
  0x10   :  { %77 = sst [smem:[#allocation8]] %s354_s12  ;;  %s61_s3 = scalar_lea.hbm %s490_s0, 16 }
  0x11   :  { %79 = sst [smem:[#allocation8 + $0x1]] %s355_s13  ;;  %s62_s6 = scalar_lea.hbm %s491_s1, 2 }
  0x12   :  { %81 = sst [smem:[#allocation8 + $0x2]] %s356_s14  ;;  %s68_s7 = sshll.u32 %s61_s3, 4  ;;  %s69_s7 = int_to_ptr.hbm [resolvable:$true] %s68_s7 }
  0x13   :  { %83 = sst [smem:[#allocation8 + $0x3]] %s357_s15  ;;  %s70_s8 = sshll.u32 %s62_s6, 4  ;;  %s71_s8 = int_to_ptr.hbm [resolvable:$true] %s70_s8 }
  0x14   :  { %85 = sst [smem:[#allocation8 + $0x4]] %s357_s15  ;;  %s364_s9 = smov [#allocation2 + $0x2]  }
  0x15   :  { %87 = sst [smem:[#allocation8 + $0x5]] %s358_s16  ;;  %s365_s10 = smov [#allocation7]  }
  0x16   :  { %89 = dma.general %s69_s7, 96, %s71_s8, %s364_s9, %s365_s10, [#allocation8], %s361_s19, 0  }
  0x17   :  { %106 = sst [smem:[#allocation10]] %s354_s12  ;;  %s90_s18 = scalar_lea.hbm %s490_s0, 21 }
  0x18   :  { %108 = sst [smem:[#allocation10 + $0x1]] %s355_s13  ;;  %s91_s22 = scalar_lea.hbm %s491_s1, 3 }
  0x19   :  { %110 = sst [smem:[#allocation10 + $0x2]] %s356_s14  ;;  %s97_s23 = sshll.u32 %s90_s18, 4  ;;  %s98_s23 = int_to_ptr.hbm [resolvable:$true] %s97_s23 }
  0x1a   :  { %112 = sst [smem:[#allocation10 + $0x3]] %s357_s15  ;;  %s99_s24 = sshll.u32 %s91_s22, 4  ;;  %s100_s24 = int_to_ptr.hbm [resolvable:$true] %s99_s24 }
  0x1b   :  { %114 = sst [smem:[#allocation10 + $0x4]] %s357_s15  ;;  %s366_s25 = smov [#allocation2 + $0x3]  }
  0x1c   :  { %116 = sst [smem:[#allocation10 + $0x5]] %s358_s16  ;;  %s367_s26 = smov [#allocation9]  }
  0x1d   :  { %118 = dma.general %s98_s23, 96, %s100_s24, %s366_s25, %s367_s26, [#allocation10], %s361_s19, 0  }
  0x1e   :  { %135 = sst [smem:[#allocation12]] %s354_s12  ;;  %s119_s29 = scalar_lea.hbm %s490_s0, 33 }
  0x1f   :  { %137 = sst [smem:[#allocation12 + $0x1]] %s355_s13  ;;  %s120_s3 = scalar_lea.hbm %s491_s1, 4 }
  0x20   :  { %139 = sst [smem:[#allocation12 + $0x2]] %s356_s14  ;;  %s126_s4 = sshll.u32 %s119_s29, 4  ;;  %s127_s4 = int_to_ptr.hbm [resolvable:$true] %s126_s4 }
  0x21   :  { %141 = sst [smem:[#allocation12 + $0x3]] %s357_s15  ;;  %s128_s5 = sshll.u32 %s120_s3, 4  ;;  %s129_s5 = int_to_ptr.hbm [resolvable:$true] %s128_s5 }
  0x22   :  { %143 = sst [smem:[#allocation12 + $0x4]] %s357_s15  ;;  %s368_s6 = smov [#allocation2 + $0x4]  }
  0x23   :  { %145 = sst [smem:[#allocation12 + $0x5]] %s358_s16  ;;  %s369_s7 = smov [#allocation11]  }
  0x24   :  { %147 = dma.general %s127_s4, 96, %s129_s5, %s368_s6, %s369_s7, [#allocation12], %s361_s19, 0  }
  0x25   :  { %164 = sst [smem:[#allocation14]] %s354_s12  ;;  %s148_s10 = scalar_lea.hbm %s490_s0, 38 }
  0x26   :  { %166 = sst [smem:[#allocation14 + $0x1]] %s355_s13  ;;  %s149_s18 = scalar_lea.hbm %s491_s1, 5 }
  0x27   :  { %168 = sst [smem:[#allocation14 + $0x2]] %s356_s14  ;;  %s155_s20 = sshll.u32 %s148_s10, 4  ;;  %s156_s20 = int_to_ptr.hbm [resolvable:$true] %s155_s20 }
  0x28   :  { %170 = sst [smem:[#allocation14 + $0x3]] %s357_s15  ;;  %s157_s21 = sshll.u32 %s149_s18, 4  ;;  %s158_s21 = int_to_ptr.hbm [resolvable:$true] %s157_s21 }
  0x29   :  { %172 = sst [smem:[#allocation14 + $0x4]] %s357_s15  ;;  %s370_s22 = smov [#allocation2 + $0x5]  }
  0x2a   :  { %174 = sst [smem:[#allocation14 + $0x5]] %s358_s16  ;;  %s371_s23 = smov [#allocation13]  }
  0x2b   :  { %176 = dma.general %s156_s20, 96, %s158_s21, %s370_s22, %s371_s23, [#allocation14], %s361_s19, 0  }
  0x2c   :  { %193 = sst [smem:[#allocation16]] %s354_s12  ;;  %s177_s26 = scalar_lea.hbm %s490_s0, 50 }
  0x2d   :  { %195 = sst [smem:[#allocation16 + $0x1]] %s355_s13  ;;  %s178_s29 = scalar_lea.hbm %s491_s1, 6 }
  0x2e   :  { %197 = sst [smem:[#allocation16 + $0x2]] %s356_s14  ;;  %s184_s30 = sshll.u32 %s177_s26, 4  ;;  %s185_s30 = int_to_ptr.hbm [resolvable:$true] %s184_s30 }
  0x2f   :  { %199 = sst [smem:[#allocation16 + $0x3]] %s357_s15  ;;  %s186_s2 = sshll.u32 %s178_s29, 4  ;;  %s187_s2 = int_to_ptr.hbm [resolvable:$true] %s186_s2 }
  0x30   :  { %201 = sst [smem:[#allocation16 + $0x4]] %s357_s15  ;;  %s372_s3 = smov [#allocation2 + $0x6]  }
  0x31   :  { %203 = sst [smem:[#allocation16 + $0x5]] %s358_s16  ;;  %s373_s4 = smov [#allocation15]  }
  0x32   :  { %205 = dma.general %s185_s30, 96, %s187_s2, %s372_s3, %s373_s4, [#allocation16], %s361_s19, 0  }
  0x33   :  { %222 = sst [smem:[#allocation18]] %s354_s12  ;;  %s206_s7 = scalar_lea.hbm %s490_s0, 55 }
  0x34   :  { %224 = sst [smem:[#allocation18 + $0x1]] %s355_s13  ;;  %s207_s10 = scalar_lea.hbm %s491_s1, 7 }
  0x35   :  { %226 = sst [smem:[#allocation18 + $0x2]] %s356_s14  ;;  %s213_s11 = sshll.u32 %s206_s7, 4  ;;  %s214_s11 = int_to_ptr.hbm [resolvable:$true] %s213_s11 }
  0x36   :  { %228 = sst [smem:[#allocation18 + $0x3]] %s357_s15  ;;  %s215_s17 = sshll.u32 %s207_s10, 4  ;;  %s216_s17 = int_to_ptr.hbm [resolvable:$true] %s215_s17 }
  0x37   :  { %230 = sst [smem:[#allocation18 + $0x4]] %s357_s15  ;;  %s374_s12 = smov [#allocation2 + $0x7]  }
  0x38   :  { %232 = sst [smem:[#allocation18 + $0x5]] %s358_s16  ;;  %s375_s0 = smov [#allocation17]  }
  0x39   :  { %234 = dma.general %s214_s11, 96, %s216_s17, %s374_s12, %s375_s0, [#allocation18], %s361_s19, 0  }
  0x3a   :  { %338 = dma.done.wait [#allocation2], 96 }
  0x3b   :  { %339 = vsyncadd [#allocation2], 4294967200 }
  0x3c   :  { %340 = dma.done.wait [#allocation2 + $0x1], 96 }
  0x3d   :  { %341 = vsyncadd [#allocation2 + $0x1], 4294967200 }
  0x3e   :  { %342 = dma.done.wait [#allocation2 + $0x2], 96 }
  0x3f   :  { %343 = vsyncadd [#allocation2 + $0x2], 4294967200 }
  0x40   :  { %344 = dma.done.wait [#allocation2 + $0x3], 96 }
  0x41   :  { %345 = vsyncadd [#allocation2 + $0x3], 4294967200 }
  0x42   :  { %346 = dma.done.wait [#allocation2 + $0x4], 96 }
  0x43   :  { %347 = vsyncadd [#allocation2 + $0x4], 4294967200 }
  0x44   :  { %348 = dma.done.wait [#allocation2 + $0x5], 96 }
  0x45   :  { %349 = vsyncadd [#allocation2 + $0x5], 4294967200 }
  0x46   :  { %350 = dma.done.wait [#allocation2 + $0x6], 96 }
  0x47   :  { %351 = vsyncadd [#allocation2 + $0x6], 4294967200 }
  0x48   :  { %352 = dma.done.wait [#allocation2 + $0x7], 96 }
  0x49   :  { %353 = vsyncadd [#allocation2 + $0x7], 4294967200 }
  0x4a   :  { %253 = vsyncmov [#allocation2] }
  0x4d   :  { %s254_s1 = vpop.sfrf %253 }
  0x4e   :  { %p308_p0 = scmp.ne.s32.totalorder %s254_s1, 0 }
  0x50   :  { %258 = shalt.err (%p308_p0)  }
  0x51   :  { %260 = vsyncmov [#allocation2 + $0x1] }
  0x54   :  { %s261_s13 = vpop.sfrf %260 }
  0x55   :  { %p309_p1 = scmp.ne.s32.totalorder %s261_s13, 0 }
  0x57   :  { %265 = shalt.err (%p309_p1)  }
  0x58   :  { %267 = vsyncmov [#allocation2 + $0x2] }
  0x5b   :  { %s268_s14 = vpop.sfrf %267 }
  0x5c   :  { %p310_p2 = scmp.ne.s32.totalorder %s268_s14, 0 }
  0x5e   :  { %272 = shalt.err (%p310_p2)  }
  0x5f   :  { %274 = vsyncmov [#allocation2 + $0x3] }
  0x62   :  { %s275_s15 = vpop.sfrf %274 }
  0x63   :  { %p311_p3 = scmp.ne.s32.totalorder %s275_s15, 0 }
  0x65   :  { %279 = shalt.err (%p311_p3)  }
  0x66   :  { %281 = vsyncmov [#allocation2 + $0x4] }
  0x69   :  { %s282_s16 = vpop.sfrf %281 }
  0x6a   :  { %p312_p4 = scmp.ne.s32.totalorder %s282_s16, 0 }
  0x6c   :  { %286 = shalt.err (%p312_p4)  }
  0x6d   :  { %288 = vsyncmov [#allocation2 + $0x5] }
  0x70   :  { %s289_s19 = vpop.sfrf %288 }
  0x71   :  { %p313_p5 = scmp.ne.s32.totalorder %s289_s19, 0 }
  0x73   :  { %293 = shalt.err (%p313_p5)  }
  0x74   :  { %295 = vsyncmov [#allocation2 + $0x6] }
  0x77   :  { %s296_s18 = vpop.sfrf %295 }
  0x78   :  { %p314_p6 = scmp.ne.s32.totalorder %s296_s18, 0 }
  0x7a   :  { %300 = shalt.err (%p314_p6)  }
  0x7b   :  { %302 = vsyncmov [#allocation2 + $0x7] }
  0x7e   :  { %s303_s20 = vpop.sfrf %302 }
  0x7f   :  { %p315_p7 = scmp.ne.s32.totalorder %s303_s20, 0 }
  0x81   :  { %307 = shalt.err (%p315_p7)  }

</bundles_post_ra>
